<compile_context>
chip_gen: v7x
topology: tpu7x:2x2x1
jax: 0.10.0
libtpu: 0.0.40
codegen_flags: <defaults>
</compile_context>

<pallas_src>
import jax
import jax.numpy as jnp
from jax.experimental import pallas as pl
from jax.experimental.pallas import tpu as pltpu

INPUT_DIM = 3          # "2dim" example: 2-d state y plus time t -> linear dim = 3
BATCH = 8
_LANES = 128
_MAX_TILE_ROWS = 4096  # 2 MiB per f32 block; 4 buffers ~= 8 MiB of scoped VMEM


def _fc2_kernel(coef_ref, x_ref, o_ref):
    # coef_ref: VMEM (8, 128)       rows 0..2 = [a_self | a_other | c], lane-alternating
    # x_ref   : VMEM (tile_r, 128)  lane-interleaved input  (even lane = y[:,0], odd = y[:,1])
    # o_ref   : VMEM (tile_r, 128)  lane-interleaved output (same layout)
    x = x_ref[...].astype(jnp.float32)

    a_self = coef_ref[0:1, :]      # (1, 128), broadcasts over rows
    a_other = coef_ref[1:2, :]
    c = coef_ref[2:3, :]

    # Per-pair feature swap via XLU rotations + lane-parity select.
    #   roll(x, 1)[l]   = x[l-1]   (prev lane)
    #   roll(x, 127)[l] = x[l+1]   (next lane; 127 == -1 mod 128, keeps shift >= 0)
    # The wrap-around lanes (0 and 127) are never selected by the parity mask,
    # so no cross-pair / cross-row contamination occurs.
    x_prev = pltpu.roll(x, shift=1, axis=1)
    x_next = pltpu.roll(x, shift=127, axis=1)
    lane = jax.lax.broadcasted_iota(jnp.int32, x.shape, 1)
    even = (lane % 2) == 0
    x_other = jnp.where(even, x_next, x_prev)

    # out = a_self * x + a_other * swapped(x) + c   -- pure VPU MACs.
    o_ref[...] = (a_self * x + a_other * x_other + c).astype(o_ref.dtype)


def _plan_tiles(n):
    """Given n = B * (D-1) flat elements, pick (tile_rows, grid, padded_rows)."""
    r_needed = -(-n // _LANES)                      # cdiv
    if r_needed <= 8:
        # Tiny batch: a single block equal to the full (padded) array.
        return r_needed, 1, r_needed
    # Large batch: >= 2 grid steps (feeds both v7x TensorCores), rows multiple
    # of 8 (sublane-dense), capped by the VMEM budget.
    grid = max(2, -(-r_needed // _MAX_TILE_ROWS))
    tile_rows = ((-(-r_needed // grid)) + 7) // 8 * 8
    grid = -(-r_needed // tile_rows)
    return tile_rows, grid, grid * tile_rows


def simple_fc_layer_forward(t, y, W, b):
    """t: scalar, y: (B, D-1), W: (D, D), b: (D,) -> (B, D-1)."""
    B, dm1 = y.shape
    D = dm1 + 1
    assert W.shape == (D, D) and b.shape == (D,)
    if dm1 != 2:
        # TODO(synk): generalize the lane-interleaved pair-swap kernel to input_dim != 3.
        raise NotImplementedError("Pallas kernel specialized to input_dim == 3 (2-d state).")

    out_dtype = y.dtype
    itemsize = jnp.dtype(out_dtype).itemsize

    # ---- fold t / W / b into lane-alternating coefficient vectors (tiny JAX glue) ----
    Wf = W.astype(jnp.float32)
    bf = b.astype(jnp.float32)
    tf = jnp.asarray(t, dtype=jnp.float32)
    M = Wf[:dm1, 1:]                                  # (2, 2) columns multiplying y
    c = tf * Wf[:dm1, 0] + bf[:dm1]                   # (2,)   t*W[:,0] + b, pre-folded

    lane = jnp.arange(_LANES)
    even = (lane % 2) == 0
    a_self = jnp.where(even, M[0, 0], M[1, 1])        # coef on the lane's own feature
    a_other = jnp.where(even, M[0, 1], M[1, 0])       # coef on the pair-swapped feature
    c_vec = jnp.where(even, c[0], c[1])
    coef = jnp.concatenate(
        [jnp.stack([a_self, a_other, c_vec], axis=0),
         jnp.zeros((5, _LANES), jnp.float32)], axis=0)  # (8, 128) — sublane-aligned slab

    # ---- flat lane-interleaved view of y (free reshapes; pad only if needed) ----
    n = B * dm1                                       # even, so feature parity == lane parity
    flat = y.reshape(n)
    tile_rows, grid_steps, total_rows = _plan_tiles(n)
    n_pad = total_rows * _LANES
    if n_pad != n:
        flat = jnp.pad(flat, (0, n_pad - n))
    x = flat.reshape(total_rows, _LANES)

    out_flat = pl.pallas_call(
        _fc2_kernel,
        out_shape=jax.ShapeDtypeStruct((total_rows, _LANES), out_dtype),
        grid_spec=pltpu.PrefetchScalarGridSpec(
            num_scalar_prefetch=0,
            grid=(grid_steps,),
            in_specs=[
                pl.BlockSpec((8, _LANES), lambda i: (0, 0)),            # coef (resident)
                pl.BlockSpec((tile_rows, _LANES), lambda i: (i, 0)),    # x tile
            ],
            out_specs=pl.BlockSpec((tile_rows, _LANES), lambda i: (i, 0)),
        ),
        compiler_params=pltpu.CompilerParams(
            # Batch tiles are independent -> shard across TensorCores on v7x.
            dimension_semantics=("parallel",),
        ),
        cost_estimate=pl.CostEstimate(
            flops=6 * n,                               # 3 MACs per element
            transcendentals=0,
            bytes_accessed=2 * n_pad * itemsize + 8 * _LANES * 4,
        ),
    )(coef, x)

    out = out_flat.reshape(n_pad)
    if n_pad != n:
        out = out[:n]
    return out.reshape(B, dm1)


def _reference_forward(t, y, W, b):
    B, dm1 = y.shape
    t_vec = jnp.ones((B, 1), dtype=y.dtype) * t
    t_and_y = jnp.concatenate([t_vec, y], axis=1)
    out = t_and_y @ W.T + b
    return out[:, :dm1]


if __name__ == "__main__":
    key = jax.random.PRNGKey(0)
    k_w, k_b, k_y1, k_y2, k_y3 = jax.random.split(key, 5)

    D = INPUT_DIM
    # Deterministic nn.Linear-style init: U(-1/sqrt(D), 1/sqrt(D))
    bound = 1.0 / jnp.sqrt(jnp.float32(D))
    W = jax.random.uniform(k_w, (D, D), jnp.float32, minval=-bound, maxval=bound)
    b = jax.random.uniform(k_b, (D,), jnp.float32, minval=-bound, maxval=bound)
    t = jnp.float32(0.37)

    # Small batch (matches the PyTorch example scale): single padded block.
    # Larger batches exercise the tiled, 2-step "parallel" grid and the
    # ragged-batch (pad + slice) path.
    for kk, B in ((k_y1, BATCH), (k_y2, 1024), (k_y3, 1000)):
        y = jax.random.normal(kk, (B, D - 1), jnp.float32)
        out = jax.block_until_ready(simple_fc_layer_forward(t, y, W, b))
        ref = _reference_forward(t, y, W, b)
        assert out.shape == (B, D - 1)
        assert jnp.allclose(out, ref, atol=1e-5, rtol=1e-5), f"mismatch at B={B}"

    print("KERNEL_OK")
</pallas_src>

<mosaic_0001>
module attributes {stable_mosaic.version = 11 : i64} {
  func.func @_fc2_kernel(%arg0: i32, %arg1: memref<8x128xf32, #tpu.memory_space<vmem>>, %arg2: memref<1x128xf32, #tpu.memory_space<vmem>>, %arg3: memref<1x128xf32, #tpu.memory_space<vmem>>) attributes {dimension_semantics = [#tpu.dimension_semantics<parallel>], iteration_bounds = array<i64: 1>, scalar_prefetch = 0 : i64, scratch_operands = 0 : i64, tpu.core_type = #tpu.core_type<tc>, window_params = [{pipeline_mode = #tpu.pipeline_mode<synchronous>, transform_indices = @transform_0, window_bounds = array<i64: 8, 128>}, {transform_indices = @transform_1, window_bounds = array<i64: 1, 128>}, {transform_indices = @transform_2, window_bounds = array<i64: 1, 128>}]} {
    %c0 = arith.constant 0 : index
    %c0_0 = arith.constant 0 : index
    %0 = vector.load %arg2[%c0, %c0_0] : memref<1x128xf32, #tpu.memory_space<vmem>>, vector<1x128xf32>
    %c0_1 = arith.constant 0 : index
    %c0_2 = arith.constant 0 : index
    %1 = vector.load %arg1[%c0_1, %c0_2] : memref<8x128xf32, #tpu.memory_space<vmem>>, vector<1x128xf32>
    %c1 = arith.constant 1 : index
    %c0_3 = arith.constant 0 : index
    %2 = vector.load %arg1[%c1, %c0_3] : memref<8x128xf32, #tpu.memory_space<vmem>>, vector<1x128xf32>
    %c2 = arith.constant 2 : index
    %c0_4 = arith.constant 0 : index
    %3 = vector.load %arg1[%c2, %c0_4] : memref<8x128xf32, #tpu.memory_space<vmem>>, vector<1x128xf32>
    %c1_i32 = arith.constant 1 : i32
    %4 = tpu.dynamic_rotate %0 by %c1_i32 dim 1 : vector<1x128xf32>, i32 -> vector<1x128xf32>
    %c127_i32 = arith.constant 127 : i32
    %5 = tpu.dynamic_rotate %0 by %c127_i32 dim 1 : vector<1x128xf32>, i32 -> vector<1x128xf32>
    %6 = tpu.iota {dimensions = array<i32: 1>} : vector<1x128xi32>
    %c2_i32 = arith.constant 2 : i32
    %c0_i32 = arith.constant 0 : i32
    %7 = arith.cmpi eq, %c2_i32, %c0_i32 : i32
    %c1_i32_5 = arith.constant 1 : i32
    %8 = arith.select %7, %c1_i32_5, %c2_i32 : i32
    %9 = vector.broadcast %8 : i32 to vector<1x128xi32>
    %10 = arith.remsi %6, %9 : vector<1x128xi32>
    %c0_i32_6 = arith.constant 0 : i32
    %11 = vector.broadcast %c0_i32_6 : i32 to vector<1x128xi32>
    %12 = arith.cmpi ne, %10, %11 : vector<1x128xi32>
    %c0_i32_7 = arith.constant 0 : i32
    %13 = vector.broadcast %c0_i32_7 : i32 to vector<1x128xi32>
    %14 = arith.cmpi slt, %10, %13 : vector<1x128xi32>
    %c0_i32_8 = arith.constant 0 : i32
    %15 = arith.cmpi slt, %8, %c0_i32_8 : i32
    %16 = vector.broadcast %15 : i1 to vector<1x128xi1>
    %17 = vector.broadcast %16 : vector<1x128xi1> to vector<1x128xi1>
    %18 = arith.xori %14, %17 : vector<1x128xi1>
    %19 = arith.andi %18, %12 : vector<1x128xi1>
    %20 = vector.broadcast %8 : i32 to vector<1x128xi32>
    %21 = arith.addi %10, %20 : vector<1x128xi32>
    %22 = arith.select %19, %21, %10 : vector<1x128xi1>, vector<1x128xi32>
    %c0_i32_9 = arith.constant 0 : i32
    %23 = vector.broadcast %c0_i32_9 : i32 to vector<1x128xi32>
    %24 = arith.cmpi eq, %22, %23 : vector<1x128xi32>
    %25 = arith.select %24, %5, %4 : vector<1x128xi1>, vector<1x128xf32>
    %26 = arith.mulf %1, %0 : vector<1x128xf32>
    %27 = arith.mulf %2, %25 : vector<1x128xf32>
    %28 = arith.addf %26, %27 : vector<1x128xf32>
    %29 = arith.addf %28, %3 : vector<1x128xf32>
    %c0_10 = arith.constant 0 : index
    %c0_11 = arith.constant 0 : index
    %30 = vector.load %arg3[%c0_10, %c0_11] : memref<1x128xf32, #tpu.memory_space<vmem>>, vector<1x128xf32>
    tpu.vector_store %arg3[%c0_10, %c0_11], %29 {strides = array<i32>} : memref<1x128xf32, #tpu.memory_space<vmem>>, vector<1x128xf32>,
    return
  }
  func.func @transform_0(%arg0: i32) -> (i32, i32) {
    %c0_i32 = arith.constant 0 : i32
    %c0_i32_0 = arith.constant 0 : i32
    %c0_i32_1 = arith.constant 0 : i32
    return %c0_i32, %c0_i32_0 : i32, i32
  }
  func.func @transform_1(%arg0: i32) -> (i32, i32) {
    %c0_i32 = arith.constant 0 : i32
    %c0_i32_0 = arith.constant 0 : i32
    return %arg0, %c0_i32 : i32, i32
  }
  func.func @transform_2(%arg0: i32) -> (i32, i32) {
    %c0_i32 = arith.constant 0 : i32
    %c0_i32_0 = arith.constant 0 : i32
    return %arg0, %c0_i32 : i32, i32
  }
}

</mosaic_0001>

<bundles_post_ra>
// kernel: tpu_custom_call.1
= control target key start
LH: loop header
LB: loop body
LE: loop exit
PB: predicated region body
PF: predicated region fallthrough
CT: control target
= control target key end

     0   :  { %7 = vsyncpa [#allocation3], 0  ;;  %s166_s0 = inlined_call_operand.hbm [shape: f32[8,128], index: 0, kind: input, shape index: {}]   ;;  %s167_s1 = inlined_call_operand.vmem [shape: f32[1,128], index: 1, kind: input, shape index: {}]   ;;  %s168_s2 = inlined_call_operand.hbm [shape: f32[1,128], index: 2, kind: output, shape index: {}]  }
   0x1   :  { %8 = vsyncpa [#allocation4], 0  ;;  %s120_s9 = smov [#allocation2]   ;;  %s72_s13 = scalar_lea.hbm %s166_s0, 128 }
   0x2   :  { %s15_s10 = sshll.u32 %s120_s9, 4  ;;  %p73_p0 = scmp.ne.s32.totalorder %s166_s0, %s72_s13  ;;  %s16_s10 = int_to_ptr.vmem [resolvable:$true] %s15_s10 }
   0x3   :  { %p76_p1 = scmp.lt.u32.totalorder %s72_s13, %s166_s0 }
   0x5   :  { %p78_p2 = pnand %p76_p1, %p73_p0 }
   0x7   :  { %81 = shalt.err (!%p78_p2)
}
   0x8   :  { %s82_s18 = scalar_lea.vmem %s16_s10, 128  ;;  %p87_p4 = scmp.lt.s32.totalorder %s16_s10, %s16_s10 }
   0x9   :  { %p83_p3 = scmp.ne.s32.totalorder %s16_s10, %s82_s18  ;;  %p88_p5 = scmp.lt.s32.totalorder %s82_s18, %s82_s18 }
   0xb   :  { %p89_p6 = por %p88_p5, %p87_p4 }
   0xd   :  { %p90_p7 = pnand %p89_p6, %p83_p3 }
   0xf   :  { %93 = shalt.err (!%p90_p7)
}
  0x10   :  { %18 = dma.hbm_to_vmem [thread:$0]  %s166_s0, 128, %s16_s10, [#allocation3]  }
  0x11   :  { %116 = dma.done.wait [#allocation3], 128  }
  0x12   :  { %117 = vsyncadd [#allocation3], 4294967168  ;;  %v24_v0 = vld [vmem:[%s167_s1] sm:$0x1]  ;;  %s121_s23 = smov 1   ;;  %s122_s24 = smov 127   ;;  %v32_v1 = vlaneseq }
  0x13   :  { %28 = vrot.lane.b32.xlu0 %v24_v0, %s121_s23  ;;  %v25_v5 = vld [vmem:[#allocation2] sm:$0x1]  ;;  %v26_v6 = vld [vmem:[#allocation2 + $0x1] sm:$0x1]  ;;  %v27_v11 = vld [vmem:[#allocation2 + $0x2] sm:$0x1] }
  0x14   :  { %v33_v2 = vand.u32 127, %v32_v1  ;;  %v48_v7 = vmul.f32 %v25_v5, %v24_v0  ;;  %s123_s0 = smov [#allocation5]  }
  0x15   :  { %s59_s25 = sshll.u32 %s123_s0, 4  ;;  %s60_s25 = int_to_ptr.vmem [resolvable:$true] %s59_s25 }
  0x16   :  { %v38_v3 = vand.u32 1, %v33_v2  ;;  %s94_s1 = scalar_lea.vmem %s60_s25, 16  ;;  %s98_s26 = scalar_lea.vmem %s60_s25, 32 }
  0x17   :  { %30 = vrot.lane.b32.xlu0 %v24_v0, %s122_s24  ;;  %p95_p8 = scmp.ne.s32.totalorder %s60_s25, %s94_s1  ;;  %p99_p9 = scmp.lt.s32.totalorder %s60_s25, %s60_s25 }
  0x18   :  { %vm46_vm0 = vcmp.eq.s32.totalorder %v38_v3, 0  ;;  %p100_p10 = scmp.lt.s32.totalorder %s98_s26, %s94_s1 }
  0x1a   :  { %p101_p11 = por %p100_p10, %p99_p9 }
  0x1c   :  { %p102_p12 = pnand %p101_p11, %p95_p8 }
  0x85   :  { %v29_v4 = vpop.permute.xlu0 %28 }
  0x89   :  { %v31_v8 = vpop.permute.xlu0 %30 }
  0x8a   :  { %v47_v9 = vsel %vm46_vm0, %v31_v8, %v29_v4 }
  0x8b   :  { %v49_v10 = vmul.f32 %v47_v9, %v26_v6 }
  0x8d   :  { %v50_v12 = vadd.f32 %v49_v10, %v48_v7 }
  0x8f   :  { %v51_v13 = vadd.f32 %v50_v12, %v27_v11 }
  0x91   :  { %52 = vst [vmem:[#allocation5] sm:$0x1] %v51_v13 }
  0x92   :  { %105 = shalt.err (!%p102_p12)
}
  0x93   :  { %s106_s29 = scalar_lea.hbm %s168_s2, 16 }
  0x94   :  { %p107_p13 = scmp.ne.s32.totalorder %s168_s2, %s106_s29  ;;  %p110_p0 = scmp.lt.u32.totalorder %s106_s29, %s168_s2 }
  0x96   :  { %p112_p1 = pnand %p110_p0, %p107_p13 }
  0x98   :  { %115 = shalt.err (!%p112_p1)
}
  0x99   :  { %62 = dma.vmem_to_hbm [thread:$0]  %s60_s25, 16, %s168_s2, [#allocation4]  }
  0x9a   :  { %118 = dma.done.wait [#allocation4], 16  }
  0x9b   :  { %119 = vsyncadd [#allocation4], 4294967280 }
  0x9c   :  { %66 = vsyncpa [#allocation3], 1 }
  0x9d   :  { %67 = vsyncpa [#allocation4], 1 }

</bundles_post_ra>
